<compile_context>
chip_gen: v6e
topology: v6e:2x2x1
jax: 0.10.0
libtpu: 0.0.40
codegen_flags: <defaults>
</compile_context>

<pallas_src>
import jax
import jax.numpy as jnp
from jax.experimental import pallas as pl
from jax.experimental.pallas import tpu as pltpu

_LANE = 128                        # lane width: last dims padded to 128
_SUB = 16                          # bf16 sublane packing: 16-row aligned M tiles
_TM_MAX = 256                      # cap on the M tile
_VMEM_BUDGET = 30 * 1024 * 1024    # per-step working set (incl. double buffers)
_VMEM_LIMIT = 48 * 1024 * 1024     # scoped VMEM limit (safe on v5e/v6e/v7x)


def _round_up(x, m):
    return (x + m - 1) // m * m


def _bridge_kernel(x_ref, w_ref, b_ref, o_ref):
    # x_ref: (tm, Kp) bf16 activations
    # w_ref: (Kp, tn) bf16 weight, already transposed to (in, out) at load time
    # b_ref: (1, tn)  f32 bias
    # o_ref: (tm, tn) output tile (lane-dense, unmasked store)
    # Full-K tile -> one MXU pass with f32 accumulation, no scratch accumulator.
    y = jnp.dot(x_ref[...], w_ref[...], preferred_element_type=jnp.float32)
    y = y + b_ref[...]                      # bias epilogue in f32 on the VPU
    o_ref[...] = jnp.maximum(y, 0.0).astype(o_ref.dtype)


def prepare_bridge_params(weight, bias):
    """One-time parameter prep (call at load time, NOT per forward).

    weight is PyTorch layout (out_features, in_features). Pads to lane
    multiples, transposes to (K, N) and casts to bf16 so the kernel's DMAs
    move bf16 and the contraction is the natural (tm,K)x(K,tn) form.
    """
    H_out, H_in = weight.shape
    Kp = _round_up(H_in, _LANE)
    Np = _round_up(H_out, _LANE)
    w = jnp.asarray(weight, jnp.float32)
    if (H_out, H_in) != (Np, Kp):
        w = jnp.pad(w, ((0, Np - H_out), (0, Kp - H_in)))
    w_kn = jnp.asarray(w.T, dtype=jnp.bfloat16)           # (Kp, Np) bf16
    b = jnp.asarray(bias, jnp.float32).reshape(1, H_out)
    if H_out != Np:
        b = jnp.pad(b, ((0, 0), (0, Np - H_out)))
    return {
        "w_kn": w_kn, "bias": b,
        "H_in": H_in, "H_out": H_out, "Kp": Kp, "Np": Np,
    }


def _choose_tm(B):
    b16 = _round_up(B, _SUB)
    if b16 <= _TM_MAX:
        return b16
    best_tm, best_pad = _TM_MAX, _round_up(B, _TM_MAX) - B
    for tm in range(_TM_MAX, _LANE - 1, -_SUB):           # 256 .. 128, 16-aligned
        pad = _round_up(B, tm) - B
        if pad < best_pad:
            best_tm, best_pad = tm, pad
    return best_tm


def bridge_forward(hidden, params):
    """relu(hidden @ weight.T + bias) using params from prepare_bridge_params.

    Accepts arbitrary leading batch dims (Linear acts on the last dim).
    """
    H_in, H_out = params["H_in"], params["H_out"]
    Kp, Np = params["Kp"], params["Np"]
    w_kn, bias = params["w_kn"], params["bias"]

    lead = hidden.shape[:-1]
    assert hidden.shape[-1] == H_in
    x2 = hidden.reshape(-1, H_in)
    B = x2.shape[0]
    out_dtype = hidden.dtype
    out_isz = jnp.dtype(out_dtype).itemsize

    tm = _choose_tm(B)
    Mp = _round_up(B, tm)

    # Working-set estimates (x2 for double-buffered pipelining).
    def _vmem_resident(tm_):
        return 2 * (Kp * Np * 2 + tm_ * Kp * 2 + Np * 4 + tm_ * Np * out_isz)

    def _vmem_tiled(tm_, tn_):
        return 2 * (tm_ * Kp * 2 + Kp * tn_ * 2 + tn_ * 4 + tm_ * tn_ * out_isz)

    resident_weight = _vmem_resident(tm) <= _VMEM_BUDGET

    if resident_weight:
        # Whole bf16 weight stays in VMEM (fetched once). 1-D grid over M.
        # Split a single M tile in two so v7x's two TensorCores both get work.
        if Mp == tm and tm % (2 * _SUB) == 0:
            tm //= 2
        grid = (Mp // tm,)
        in_specs = [
            pl.BlockSpec((tm, Kp), lambda i: (i, 0)),
            pl.BlockSpec((Kp, Np), lambda i: (0, 0)),     # constant -> DMA'd once
            pl.BlockSpec((1, Np), lambda i: (0, 0)),
        ]
        out_spec = pl.BlockSpec((tm, Np), lambda i: (i, 0))
        dim_sem = ("parallel",)
        tn = Np
    else:
        # Tile N (full K). Pick the largest lane-multiple tn dividing Np that
        # fits the budget; shrink tm as a last resort.
        nlanes = Np // _LANE
        tn = _LANE
        for d in range(nlanes, 0, -1):
            if nlanes % d == 0 and _vmem_tiled(tm, _LANE * d) <= _VMEM_BUDGET:
                tn = _LANE * d
                break
        while _vmem_tiled(tm, tn) > _VMEM_BUDGET and tm > _SUB:
            tm = max(_SUB, (tm // 2) // _SUB * _SUB)
            Mp = _round_up(B, tm)

        # Grid ordering: stream the larger operand only once.
        w_bytes = Kp * Np * 2
        x_bytes = Mp * Kp * 2
        j_outer = (w_bytes + (Np // tn) * x_bytes) <= ((Mp // tm) * w_bytes + x_bytes)
        if j_outer:
            grid = (Np // tn, Mp // tm)
            in_specs = [
                pl.BlockSpec((tm, Kp), lambda j, i: (i, 0)),
                pl.BlockSpec((Kp, tn), lambda j, i: (0, j)),
                pl.BlockSpec((1, tn), lambda j, i: (0, j)),
            ]
            out_spec = pl.BlockSpec((tm, tn), lambda j, i: (i, j))
        else:
            grid = (Mp // tm, Np // tn)
            in_specs = [
                pl.BlockSpec((tm, Kp), lambda i, j: (i, 0)),
                pl.BlockSpec((Kp, tn), lambda i, j: (0, j)),
                pl.BlockSpec((1, tn), lambda i, j: (0, j)),
            ]
            out_spec = pl.BlockSpec((tm, tn), lambda i, j: (i, j))
        dim_sem = ("parallel", "parallel")

    # Cast + pad activations (fused into a single pass by XLA under jit).
    x = x2.astype(jnp.bfloat16)
    if (Mp, Kp) != (B, H_in):
        x = jnp.pad(x, ((0, Mp - B), (0, Kp - H_in)))

    out = pl.pallas_call(
        _bridge_kernel,
        out_shape=jax.ShapeDtypeStruct((Mp, Np), out_dtype),
        grid_spec=pltpu.PrefetchScalarGridSpec(
            num_scalar_prefetch=0,
            grid=grid,
            in_specs=in_specs,
            out_specs=out_spec,
        ),
        compiler_params=pltpu.CompilerParams(
            dimension_semantics=dim_sem,
            vmem_limit_bytes=_VMEM_LIMIT,
        ),
    )(x, w_kn, bias)

    out = out[:B, :H_out]
    return out.reshape(lead + (H_out,))


if __name__ == "__main__":
    # Representative small size (lane-aligned so the Pallas path is sensible).
    hidden_size = 256
    batch = 128

    key = jax.random.PRNGKey(0)
    k_x, k_w, k_b = jax.random.split(key, 3)

    # Deterministic synthetic parameters, PyTorch nn.Linear layout/init scale.
    bound = 1.0 / (hidden_size ** 0.5)
    weight = jax.random.uniform(
        k_w, (hidden_size, hidden_size), jnp.float32, -bound, bound
    )  # (out_features, in_features)
    bias = jax.random.uniform(k_b, (hidden_size,), jnp.float32, -bound, bound)

    x = jax.random.normal(k_x, (batch, hidden_size), jnp.float32)

    # One-time weight prep outside the per-call jitted path.
    params = prepare_bridge_params(weight, bias)

    fwd = jax.jit(lambda h: bridge_forward(h, params))
    out = jax.block_until_ready(fwd(x))

    # Plain-JAX reference (same math as nn.Linear + relu, f32).
    ref = jnp.maximum(x @ weight.T + bias, 0.0)
    assert out.shape == (batch, hidden_size)
    # bf16 MXU inputs with f32 accumulation -> bf16-grade tolerance.
    assert jnp.allclose(out, ref, atol=3e-2, rtol=3e-2), float(
        jnp.max(jnp.abs(out - ref))
    )

    print("KERNEL_OK")
</pallas_src>

<mosaic_0001>
module attributes {stable_mosaic.version = 11 : i64} {
  func.func @_bridge_kernel(%arg0: i32, %arg1: memref<64x256xbf16, #tpu.memory_space<vmem>>, %arg2: memref<256x256xbf16, #tpu.memory_space<vmem>>, %arg3: memref<1x256xf32, #tpu.memory_space<vmem>>, %arg4: memref<64x256xf32, #tpu.memory_space<vmem>>) attributes {dimension_semantics = [#tpu.dimension_semantics<parallel>], iteration_bounds = array<i64: 2>, scalar_prefetch = 0 : i64, scratch_operands = 0 : i64, tpu.core_type = #tpu.core_type<tc>, window_params = [{transform_indices = @transform_0, window_bounds = array<i64: 64, 256>}, {pipeline_mode = #tpu.pipeline_mode<synchronous>, transform_indices = @transform_1, window_bounds = array<i64: 256, 256>}, {pipeline_mode = #tpu.pipeline_mode<synchronous>, transform_indices = @transform_2, window_bounds = array<i64: 1, 256>}, {transform_indices = @transform_3, window_bounds = array<i64: 64, 256>}]} {
    %c0 = arith.constant 0 : index
    %c0_0 = arith.constant 0 : index
    %0 = vector.load %arg1[%c0, %c0_0] : memref<64x256xbf16, #tpu.memory_space<vmem>>, vector<64x256xbf16>
    %c0_1 = arith.constant 0 : index
    %c0_2 = arith.constant 0 : index
    %1 = vector.load %arg2[%c0_1, %c0_2] : memref<256x256xbf16, #tpu.memory_space<vmem>>, vector<256x256xbf16>
    %cst = arith.constant dense<0.000000e+00> : vector<64x256xf32>
    %2 = tpu.matmul %0, %1, %cst {dimension_numbers = #tpu.dot_dimension_numbers<[1], [0], [0], [1], [0, 0, 1, 1], [], []>} : vector<64x256xbf16>, vector<256x256xbf16>, vector<64x256xf32> -> vector<64x256xf32>
    %c0_3 = arith.constant 0 : index
    %c0_4 = arith.constant 0 : index
    %3 = vector.load %arg3[%c0_3, %c0_4] : memref<1x256xf32, #tpu.memory_space<vmem>>, vector<1x256xf32>
    %4 = vector.broadcast %3 : vector<1x256xf32> to vector<64x256xf32>
    %5 = arith.addf %2, %4 : vector<64x256xf32>
    %cst_5 = arith.constant 0.000000e+00 : f32
    %6 = vector.broadcast %cst_5 : f32 to vector<64x256xf32>
    %7 = arith.maximumf %5, %6 : vector<64x256xf32>
    %c0_6 = arith.constant 0 : index
    %c0_7 = arith.constant 0 : index
    %8 = vector.load %arg4[%c0_6, %c0_7] : memref<64x256xf32, #tpu.memory_space<vmem>>, vector<64x256xf32>
    tpu.vector_store %arg4[%c0_6, %c0_7], %7 {strides = array<i32>} : memref<64x256xf32, #tpu.memory_space<vmem>>, vector<64x256xf32>,
    return
  }
  func.func @transform_0(%arg0: i32) -> (i32, i32) {
    %c0_i32 = arith.constant 0 : i32
    %c0_i32_0 = arith.constant 0 : i32
    return %arg0, %c0_i32 : i32, i32
  }
  func.func @transform_1(%arg0: i32) -> (i32, i32) {
    %c0_i32 = arith.constant 0 : i32
    %c0_i32_0 = arith.constant 0 : i32
    %c0_i32_1 = arith.constant 0 : i32
    return %c0_i32, %c0_i32_0 : i32, i32
  }
  func.func @transform_2(%arg0: i32) -> (i32, i32) {
    %c0_i32 = arith.constant 0 : i32
    %c0_i32_0 = arith.constant 0 : i32
    %c0_i32_1 = arith.constant 0 : i32
    return %c0_i32, %c0_i32_0 : i32, i32
  }
  func.func @transform_3(%arg0: i32) -> (i32, i32) {
    %c0_i32 = arith.constant 0 : i32
    %c0_i32_0 = arith.constant 0 : i32
    return %arg0, %c0_i32 : i32, i32
  }
}

</mosaic_0001>

<bundles_post_ra>
// kernel: _lambda_.1
= control target key start
LH: loop header
LB: loop body
LE: loop exit
PB: predicated region body
PF: predicated region fallthrough
CT: control target
= control target key end

     0   :  { %8 = vsyncpa [#allocation3], 0  ;;  %s1117_s0 = inlined_call_operand.vmem [shape: bf16[128,256], index: 0, kind: input, shape index: {}]   ;;  %s1118_s1 = inlined_call_operand.vmem [shape: bf16[256,256], index: 1, kind: input, shape index: {}]   ;;  %s1119_s2 = inlined_call_operand.vmem [shape: f32[1,256], index: 2, kind: input, shape index: {}]   ;;  %s1120_s3 = inlined_call_operand.hbm [shape: f32[128,256], index: 3, kind: output, shape index: {}]  }
   0x1   :  { %10 = vsyncpa [#allocation3 + $0x1], 0  ;;  %s884_s12 = smov 0   ;;  %s886_s13 = smov 0  }
   0x2   :  { %s888_s14 = smov 0   ;;  %s890_s15 = smov 0  }
   0x3 LB: > { %s905_s16 = sadd.s32 4294967295, %s859_s15   ;;  %s609_s17 = sadd.s32 4294967294, %s859_s15   ;;  %s859_s15 = sphi %s890_s15, %s1126_s15   ;;  %s855_s14 = sphi %s888_s14, %s1125_s14   ;;  %s851_s13 = sphi %s886_s13, %s1124_s13   ;;  %s847_s12 = sphi %s884_s12, %s1123_s12  }
   0x4   : > { %s909_s18 = sadd.s32 1, %s859_s15   ;;  %s91_s19 = sadd.s32 1, %s855_s14 }
   0x5   : > { %s88_s20 = ssub.s32 %s859_s15, %s909_s18  ;;  %p101_p0 = scmp.ne.s32.totalorder %s855_s14, %s851_s13 }
   0x6   : > { %p89_p1 = scmp.eq.s32.totalorder %s88_s20, 0  ;;  %p102_p2 = scmp.eq.s32.totalorder %s905_s16, 1 }
   0x7   : > { %p107_p3 = scmp.ne.s32.totalorder %s851_s13, %s847_s12  ;;  %p108_p4 = scmp.eq.s32.totalorder %s609_s17, 1 }
   0x8   : > { %s920_s21 = scalar_select %p89_p1, %s855_s14, %s91_s19  }
   0x9   : > { %p922_p5 = por %p102_p2, %p101_p0  ;;  %p926_p6 = por %p108_p4, %p107_p3 }
   0xa   : > { %p612_p7 = scmp.ge.s32.totalorder %s859_s15, 1  ;;  %p142_p8 = scmp.lt.s32.totalorder %s859_s15, 3 }
   0xc   : > { %p143_p9 = pnand %p612_p7, %p142_p8 }
   0xd   : > { %s614_s7 = sshll.u32 (!%p143_p9), %s905_s16, 3  ;;  %s164_s25 = sand.u32 (!%p143_p9), 1, %s851_s13  }
   0xe   : > { %146 = sbr.rel (%p143_p9) target bundleno = 309 (0x135), region = 32  ;;  %p168_p10 = scmp.lt.s32.totalorder (!%p143_p9), %s614_s7, 15 }
   0xf   : > { %s613_s26 = sshll.u32 (!%p143_p9), %s164_s25, 7  ;;  %s665_s27 = sshll.u32 (!%p143_p9), %s905_s16, 11 }
  0x10   : > { %s1067_s4 = scalar_lea.hbm (!%p143_p9), %s1120_s3, %s665_s27  ;;  %s1077_s16 = scalar_lea.sflag (!%p143_p9), [#allocation3], %s164_s25 }
  0x11   : > { %s861_s6 = smov (!%p143_p9), [#allocation2]  }
  0x12   : > { %s803_s9 = sshll.u32 (!%p143_p9), %s861_s6, 4  ;;  %s804_s9 = int_to_ptr.vmem [resolvable:$false] %s803_s9 }
  0x13   : > { %v739_v0 = vld [vmem:[%s1118_s1 + $0x74] ss:$8 sps:$4 sm:$0xff]   ;;  %v741_v1 = vld [vmem:[%s1118_s1 + $0x70] ss:$8 sps:$4 sm:$0xff]   ;;  %v742_v2 = vld [vmem:[%s1118_s1 + $0x64] ss:$8 sps:$4 sm:$0xff]   ;;  %v217_v40 = vlaneseq }
  0x14   : > { %427 = vmatprep.subr.bf16.mxu0 %v739_v0  ;;  %666 = vmatprep.subr.bf16.mxu1 %v739_v0  ;;  %v744_v3 = vld [vmem:[%s1118_s1 + $0x60] ss:$8 sps:$4 sm:$0xff]   ;;  %v745_v4 = vld [vmem:[%s1118_s1 + $0x54] ss:$8 sps:$4 sm:$0xff]   ;;  %v747_v5 = vld [vmem:[%s1118_s1 + $0x50] ss:$8 sps:$4 sm:$0xff]  }
  0x15   : > { %428 = vmatpush1.bf16.msra.mxu0 %v741_v1  ;;  %682 = vmatpush1.bf16.msra.mxu1 %v741_v1  ;;  %v748_v6 = vld [vmem:[%s1118_s1 + $0x44] ss:$8 sps:$4 sm:$0xff]   ;;  %v750_v7 = vld [vmem:[%s1118_s1 + $0x40] ss:$8 sps:$4 sm:$0xff]   ;;  %v751_v8 = vld [vmem:[%s1118_s1 + $0x34] ss:$8 sps:$4 sm:$0xff]  }
  0x16   : > { %429 = vmatprep.subr.bf16.mxu0 %v742_v2  ;;  %667 = vmatprep.subr.bf16.mxu1 %v742_v2  ;;  %s1128_s7 = smov (!%p168_p10, %s614_s7), 15  ;;  %v753_v9 = vld [vmem:[%s1118_s1 + $0x30] ss:$8 sps:$4 sm:$0xff]   ;;  %v754_v10 = vld [vmem:[%s1118_s1 + $0x24] ss:$8 sps:$4 sm:$0xff]   ;;  %v218_v41 = vshrl.u32 %v217_v40, 7 }
  0x17   : > { %s663_s29 = sshll.u32 %s1128_s7, 3  ;;  %v756_v11 = vld [vmem:[%s1118_s1 + $0x20] ss:$8 sps:$4 sm:$0xff]   ;;  %v757_v12 = vld [vmem:[%s1118_s1 + $0x14] ss:$8 sps:$4 sm:$0xff]   ;;  %s805_s10 = scalar_lea.vmem %s804_s9, 4096 }
  0x18   : > { %s972_s8 = scalar_lea.vmem %s1117_s0, %s663_s29  ;;  %v759_v14 = vld [vmem:[%s1118_s1 + $0x10] ss:$8 sps:$4 sm:$0xff]   ;;  %v760_v16 = vld [vmem:[%s1118_s1 + $0x4] ss:$8 sps:$4 sm:$0xff]   ;;  %v762_v17 = vld [vmem:[%s1118_s1] ss:$8 sps:$4 sm:$0xff]  }
  0x19   : > { %430 = vmatpush1.bf16.msra.mxu0 %v744_v3  ;;  %683 = vmatpush1.bf16.msra.mxu1 %v744_v3  ;;  %v789_v13 = vld [vmem:[%s972_s8 + $0x4] ss:$8 sps:$4 sm:$0xff]   ;;  %v763_v18 = vld [vmem:[%s1118_s1 + $0xf4] ss:$8 sps:$4 sm:$0xff]   ;;  %v765_v19 = vld [vmem:[%s1118_s1 + $0xf0] ss:$8 sps:$4 sm:$0xff]  }
  0x1a   : > { %431 = vmatprep.subr.bf16.mxu0 %v745_v4  ;;  %668 = vmatprep.subr.bf16.mxu1 %v745_v4  ;;  %v792_v15 = vld [vmem:[%s972_s8 + $0x24] ss:$8 sps:$4 sm:$0xff]   ;;  %v768_v21 = vld [vmem:[%s1118_s1 + $0xe0] ss:$8 sps:$4 sm:$0xff]   ;;  %v769_v22 = vld [vmem:[%s1118_s1 + $0xd4] ss:$8 sps:$4 sm:$0xff]  }
  0x1b   : > { %459 = vmatprep.mubr.bf16.mxu0 %v789_v13  ;;  %479 = vmatprep.mubr.bf16.mxu1 %v792_v15  ;;  %v766_v20 = vld [vmem:[%s1118_s1 + $0xe4] ss:$8 sps:$4 sm:$0xff]   ;;  %v771_v23 = vld [vmem:[%s1118_s1 + $0xd0] ss:$8 sps:$4 sm:$0xff]   ;;  %v774_v25 = vld [vmem:[%s1118_s1 + $0xc0] ss:$8 sps:$4 sm:$0xff]  }
  0x1c   : > { %v772_v24 = vld [vmem:[%s1118_s1 + $0xc4] ss:$8 sps:$4 sm:$0xff]   ;;  %v775_v26 = vld [vmem:[%s1118_s1 + $0xb4] ss:$8 sps:$4 sm:$0xff]   ;;  %v777_v27 = vld [vmem:[%s1118_s1 + $0xb0] ss:$8 sps:$4 sm:$0xff]  }
  0x1d   : > { %432 = vmatpush1.bf16.msra.mxu0 %v747_v5  ;;  %684 = vmatpush1.bf16.msra.mxu1 %v747_v5  ;;  %v778_v28 = vld [vmem:[%s1118_s1 + $0xa4] ss:$8 sps:$4 sm:$0xff]   ;;  %v780_v29 = vld [vmem:[%s1118_s1 + $0xa0] ss:$8 sps:$4 sm:$0xff]   ;;  %v781_v30 = vld [vmem:[%s1118_s1 + $0x94] ss:$8 sps:$4 sm:$0xff]  }
  0x1e   : > { %433 = vmatprep.subr.bf16.mxu0 %v748_v6  ;;  %669 = vmatprep.subr.bf16.mxu1 %v748_v6  ;;  %v783_v31 = vld [vmem:[%s1118_s1 + $0x90] ss:$8 sps:$4 sm:$0xff]   ;;  %v784_v32 = vld [vmem:[%s1118_s1 + $0x84] ss:$8 sps:$4 sm:$0xff]   ;;  %v786_v33 = vld [vmem:[%s1118_s1 + $0x80] ss:$8 sps:$4 sm:$0xff]  }
  0x1f   : > { %v787_v34 = vld [vmem:[%s972_s8] ss:$8 sps:$4 sm:$0xff]   ;;  %v793_v36 = vld [vmem:[%s972_s8 + $0x14] ss:$8 sps:$4 sm:$0xff]   ;;  %v797_v38 = vld [vmem:[%s972_s8 + $0x10] ss:$8 sps:$4 sm:$0xff]  }
  0x20   : > { %v790_v35 = vld [vmem:[%s972_s8 + $0x20] ss:$8 sps:$4 sm:$0xff]   ;;  %v795_v37 = vld [vmem:[%s972_s8 + $0x34] ss:$8 sps:$4 sm:$0xff]   ;;  %v798_v39 = vld [vmem:[%s972_s8 + $0x30] ss:$8 sps:$4 sm:$0xff]  }
  0x21   : > { %434 = vmatpush1.bf16.msra.mxu0 %v750_v7  ;;  %685 = vmatpush1.bf16.msra.mxu1 %v750_v7  ;;  %v219_v42 = vsub.s32 0, %v218_v41  ;;  %v215_v43 = vld [vmem:[%s1119_s2] sm:$0x3]  ;;  %v223_v44 = vsub.s32 1, %v218_v41  ;;  %s1048_s8 = scalar_lea.vmem [#allocation2], %s613_s26 }
  0x22   : > { %435 = vmatprep.subr.bf16.mxu0 %v751_v8  ;;  %670 = vmatprep.subr.bf16.mxu1 %v751_v8  ;;  %s547_s28 = sshll.u32 %s1048_s8, 4  ;;  %s1069_s28 = int_to_ptr.vmem [resolvable:$true] %s547_s28 }
  0x23   : > { %v220_v45 = vrot.slane %v215_v43, %v219_v42  ;;  %v224_v46 = vrot.slane %v215_v43, %v223_v44  ;;  %s799_s5 = scalar_lea.vmem %s1069_s28, 2048  ;;  %p806_p0 = scmp.lt.s32.totalorder %s1069_s28, %s804_s9 }
  0x24   : > { %p800_p11 = scmp.ne.s32.totalorder %s1069_s28, %s799_s5  ;;  %p807_p1 = scmp.lt.s32.totalorder %s805_s10, %s799_s5 }
  0x25   : > { %436 = vmatpush1.bf16.msra.mxu0 %v753_v9  ;;  %686 = vmatpush1.bf16.msra.mxu1 %v753_v9 }
  0x26   : > { %437 = vmatprep.subr.bf16.mxu0 %v754_v10  ;;  %671 = vmatprep.subr.bf16.mxu1 %v754_v10  ;;  %p801_p12 = pnand %p800_p11, %p922_p5  ;;  %p808_p2 = por %p807_p1, %p806_p0 }
  0x28   : > { %p802_p13 = pneg %p801_p12 }
  0x29   : > { %438 = vmatpush1.bf16.msra.mxu0 %v756_v11  ;;  %687 = vmatpush1.bf16.msra.mxu1 %v756_v11 }
  0x2a   : > { %439 = vmatprep.subr.bf16.mxu0 %v757_v12  ;;  %672 = vmatprep.subr.bf16.mxu1 %v757_v12  ;;  %p809_p3 = pnand %p808_p2, %p802_p13 }
  0x2d   : > { %440 = vmatpush1.bf16.msra.mxu0 %v759_v14  ;;  %688 = vmatpush1.bf16.msra.mxu1 %v759_v14 }
  0x2e   : > { %441 = vmatprep.subr.bf16.mxu0 %v760_v16  ;;  %673 = vmatprep.subr.bf16.mxu1 %v760_v16 }
  0x31   : > { %442 = vmatpush1.bf16.msra.mxu0 %v762_v17  ;;  %689 = vmatpush1.bf16.msra.mxu1 %v762_v17 }
  0x32   : > { %443 = vmatprep.subr.bf16.mxu0 %v763_v18  ;;  %674 = vmatprep.subr.bf16.mxu1 %v763_v18 }
  0x35   : > { %444 = vmatpush2.bf16.msra.mxu0 %v765_v19  ;;  %690 = vmatpush2.bf16.msra.mxu1 %v765_v19 }
  0x36   : > { %445 = vmatprep.subr.bf16.mxu0 %v766_v20  ;;  %675 = vmatprep.subr.bf16.mxu1 %v766_v20 }
  0x39   : > { %446 = vmatpush2.bf16.msra.mxu0 %v768_v21  ;;  %691 = vmatpush2.bf16.msra.mxu1 %v768_v21 }
  0x3a   : > { %447 = vmatprep.subr.bf16.mxu0 %v769_v22  ;;  %676 = vmatprep.subr.bf16.mxu1 %v769_v22 }
  0x3d   : > { %448 = vmatpush2.bf16.msra.mxu0 %v771_v23  ;;  %692 = vmatpush2.bf16.msra.mxu1 %v771_v23 }
  0x3e   : > { %449 = vmatprep.subr.bf16.mxu0 %v772_v24  ;;  %677 = vmatprep.subr.bf16.mxu1 %v772_v24 }
  0x41   : > { %450 = vmatpush2.bf16.msra.mxu0 %v774_v25  ;;  %693 = vmatpush2.bf16.msra.mxu1 %v774_v25 }
  0x42   : > { %451 = vmatprep.subr.bf16.mxu0 %v775_v26  ;;  %678 = vmatprep.subr.bf16.mxu1 %v775_v26 }
  0x45   : > { %452 = vmatpush2.bf16.msra.mxu0 %v777_v27  ;;  %694 = vmatpush2.bf16.msra.mxu1 %v777_v27 }
  0x46   : > { %453 = vmatprep.subr.bf16.mxu0 %v778_v28  ;;  %679 = vmatprep.subr.bf16.mxu1 %v778_v28 }
  0x49   : > { %454 = vmatpush2.bf16.msra.mxu0 %v780_v29  ;;  %695 = vmatpush2.bf16.msra.mxu1 %v780_v29 }
  0x4a   : > { %455 = vmatprep.subr.bf16.mxu0 %v781_v30  ;;  %680 = vmatprep.subr.bf16.mxu1 %v781_v30 }
  0x4d   : > { %456 = vmatpush2.bf16.msra.mxu0 %v783_v31  ;;  %696 = vmatpush2.bf16.msra.mxu1 %v783_v31 }
  0x4e   : > { %457 = vmatprep.subr.bf16.mxu0 %v784_v32  ;;  %681 = vmatprep.subr.bf16.mxu1 %v784_v32 }
  0x51   : > { %458 = vmatpush2.bf16.msra.mxu0 %v786_v33  ;;  %697 = vmatpush2.bf16.msra.mxu1 %v786_v33 }
  0x54   : > { %460 = vmatmul.mubr.bf16.vlgmr.msra.gmra.mxu0 %v787_v34  ;;  %480 = vmatmul.mubr.bf16.vlgmr.msra.gmra.mxu1 %v790_v35 }
  0x55   : > { %469 = vmatprep.mubr.bf16.mxu0 %v793_v36  ;;  %489 = vmatprep.mubr.bf16.mxu1 %v795_v37 }
  0x5c   : > { %470 = vmatmul.mubr.bf16.gmra.mxu0 %v797_v38  ;;  %490 = vmatmul.mubr.bf16.gmra.mxu1 %v798_v39 }
 0x114   : > { %v461_v47 = vpop.f32.mrf.mxu0  ;;  %v481_v48 = vpop.f32.mrf.mxu1 }
 0x115   : > { %v462_v49 = vadd.f32 %v461_v47, %v220_v45  ;;  %v482_v50 = vadd.f32 %v481_v48, %v220_v45 }
 0x116   : > { %v463_v51 = vpop.f32.mrf.mxu0  ;;  %v483_v52 = vpop.f32.mrf.mxu1 }
 0x117   : > { %v500_v53 = vmax.f32 %v462_v49, 0.0  ;;  %v508_v54 = vmax.f32 %v482_v50, 0.0  ;;  %v464_v55 = vadd.f32 %v463_v51, %v224_v46  ;;  %v484_v56 = vadd.f32 %v483_v52, %v224_v46 }
 0x118   : > { %v465_v57 = vpop.f32.mrf.mxu0  ;;  %v485_v58 = vpop.f32.mrf.mxu1 }
 0x119   : > { %516 = vst [vmem:[%s1048_s8] sm:$0xff] %v500_v53  ;;  %524 = vst [vmem:[%s1048_s8 + $0x40] sm:$0xff] %v508_v54  ;;  %v501_v59 = vmax.f32 %v464_v55, 0.0  ;;  %v509_v60 = vmax.f32 %v484_v56, 0.0  ;;  %v466_v61 = vadd.f32 %v465_v57, %v220_v45  ;;  %v486_v62 = vadd.f32 %v485_v58, %v220_v45 }
 0x11a   : > { %v467_v63 = vpop.f32.mrf.mxu0  ;;  %v487_v0 = vpop.f32.mrf.mxu1 }
 0x11b   : > { %517 = vst [vmem:[%s1048_s8 + $0x8] sm:$0xff] %v501_v59  ;;  %525 = vst [vmem:[%s1048_s8 + $0x48] sm:$0xff] %v509_v60  ;;  %v502_v1 = vmax.f32 %v466_v61, 0.0  ;;  %v510_v2 = vmax.f32 %v486_v62, 0.0  ;;  %v468_v3 = vadd.f32 %v467_v63, %v224_v46  ;;  %v488_v4 = vadd.f32 %v487_v0, %v224_v46 }
 0x11c   : > { %v471_v5 = vpop.f32.mrf.mxu0  ;;  %v491_v6 = vpop.f32.mrf.mxu1 }
 0x11d   : > { %518 = vst [vmem:[%s1048_s8 + $0x10] sm:$0xff] %v502_v1  ;;  %526 = vst [vmem:[%s1048_s8 + $0x50] sm:$0xff] %v510_v2  ;;  %v503_v7 = vmax.f32 %v468_v3, 0.0  ;;  %v511_v8 = vmax.f32 %v488_v4, 0.0  ;;  %v472_v9 = vadd.f32 %v471_v5, %v220_v45  ;;  %v492_v10 = vadd.f32 %v491_v6, %v220_v45 }
 0x11e   : > { %v473_v11 = vpop.f32.mrf.mxu0  ;;  %v493_v12 = vpop.f32.mrf.mxu1 }
 0x11f   : > { %519 = vst [vmem:[%s1048_s8 + $0x18] sm:$0xff] %v503_v7  ;;  %527 = vst [vmem:[%s1048_s8 + $0x58] sm:$0xff] %v511_v8  ;;  %v504_v13 = vmax.f32 %v472_v9, 0.0  ;;  %v512_v14 = vmax.f32 %v492_v10, 0.0  ;;  %v474_v15 = vadd.f32 %v473_v11, %v224_v46  ;;  %v494_v16 = vadd.f32 %v493_v12, %v224_v46 }
 0x120   : > { %v475_v17 = vpop.f32.mrf.mxu0  ;;  %v495_v18 = vpop.f32.mrf.mxu1 }
 0x121   : > { %520 = vst [vmem:[%s1048_s8 + $0x20] sm:$0xff] %v504_v13  ;;  %528 = vst [vmem:[%s1048_s8 + $0x60] sm:$0xff] %v512_v14  ;;  %v505_v19 = vmax.f32 %v474_v15, 0.0  ;;  %v513_v20 = vmax.f32 %v494_v16, 0.0  ;;  %v476_v21 = vadd.f32 %v475_v17, %v220_v45  ;;  %v496_v22 = vadd.f32 %v495_v18, %v220_v45 }
 0x122   : > { %v477_v23 = vpop.f32.mrf.mxu0  ;;  %v497_v24 = vpop.f32.mrf.mxu1 }
 0x123   : > { %521 = vst [vmem:[%s1048_s8 + $0x28] sm:$0xff] %v505_v19  ;;  %529 = vst [vmem:[%s1048_s8 + $0x68] sm:$0xff] %v513_v20  ;;  %v506_v25 = vmax.f32 %v476_v21, 0.0  ;;  %v514_v26 = vmax.f32 %v496_v22, 0.0  ;;  %v478_v27 = vadd.f32 %v477_v23, %v224_v46  ;;  %v498_v28 = vadd.f32 %v497_v24, %v224_v46 }
 0x125   : > { %522 = vst [vmem:[%s1048_s8 + $0x30] sm:$0xff] %v506_v25  ;;  %530 = vst [vmem:[%s1048_s8 + $0x70] sm:$0xff] %v514_v26  ;;  %v507_v29 = vmax.f32 %v478_v27, 0.0  ;;  %v515_v30 = vmax.f32 %v498_v28, 0.0 }
 0x127   : > { %523 = vst [vmem:[%s1048_s8 + $0x38] sm:$0xff] %v507_v29  ;;  %531 = vst [vmem:[%s1048_s8 + $0x78] sm:$0xff] %v515_v30 }
 0x128   : > { %812 = shalt.err (!%p809_p3)
}
 0x129   : > { %s813_s7 = scalar_lea.hbm %s1067_s4, 2048  ;;  %s817_s19 = scalar_lea.hbm %s1120_s3, 4096 }
 0x12a   : > { %p814_p4 = scmp.ne.s32.totalorder %s1067_s4, %s813_s7  ;;  %p818_p9 = scmp.lt.s32.totalorder %s1067_s4, %s1120_s3 }
 0x12b   : > { %p819_p10 = scmp.lt.s32.totalorder %s817_s19, %s813_s7 }
 0x12c   : > { %p815_p7 = pnand %p814_p4, %p922_p5 }
 0x12d   : > { %p820_p11 = por %p819_p10, %p818_p9 }
 0x12e   : > { %p816_p8 = pneg %p815_p7 }
 0x130   : > { %p821_p12 = pnand %p820_p11, %p816_p8 }
 0x132   : > { %824 = shalt.err (!%p821_p12)
}
 0x133   : > { %s862_s25 = smov 256   ;;  %s863_s26 = smov 16  }
 0x134   : > { %698 = dma.vmem_to_hbm [thread:$0]  (%p922_p5), %s1069_s28, 2048, %s1067_s4, %s1077_s16, %s862_s25, %s862_s25, %s863_s26  }
 0x135 PF: > { %p704_p13 = scmp.ge.s32.totalorder %s859_s15, 2  ;;  %s562_s8 = sand.u32 1, %s847_s12  }
 0x136   : > { %s563_s27 = scalar_lea.sflag [#allocation3], %s562_s8 }
 0x137   : > { %p701_p0 = pnand %p704_p13, %p926_p6 }
 0x139   : > { %p702_p1 = pneg %p701_p0 }
 0x13b   : > { %842 = dma.done.wait (%p702_p1), %s563_s27, 2048  }
 0x13c   : > { %844 = vsyncadd (%p702_p1), %s563_s27, 4294965248  ;;  %p13_p2 = scmp.ge.s32.totalorder %s909_s18, 4   ;;  %s1123_s12 = smov %s851_s13 }
 0x13d   : > { %s1124_s13 = smov %s855_s14  ;;  %s1125_s14 = smov %s920_s21 }
 0x13e   : > { %s1126_s15 = smov %s909_s18  ;;  %15 = sbr.rel (!%p13_p2) target bundleno = 3 (0x3), region = 67 }
 0x143   :  { %568 = vsyncpa [#allocation3], 1 }
 0x144   :  { %570 = vsyncpa [#allocation3 + $0x1], 1 }

</bundles_post_ra>
